<compile_context>
chip_gen: v5e
topology: v5e:2x2
jax: 0.10.0
libtpu: 0.0.40
codegen_flags: <defaults>
</compile_context>

<pallas_src>
import jax
import jax.numpy as jnp
from jax.experimental import pallas as pl
from jax.experimental.pallas import tpu as pltpu


def _round_up(x, m):
    return ((x + m - 1) // m) * m


def _ae_kernel(x_ref, we_ref, be_ref, wd_ref, bd_ref, o_ref):
    # x_ref: (bm, Dp) bf16   we_ref: (Dp, Lp) bf16   be_ref: (1, Lp) f32
    # wd_ref: (Lp, Dp) bf16  bd_ref: (1, Dp) f32     o_ref: (bm, Dp) f32
    x = x_ref[...]
    # Encoder: Linear on MXU (bf16 in, f32 accumulate), bias + ReLU in f32.
    z = jnp.dot(x, we_ref[...], preferred_element_type=jnp.float32)
    z = jnp.maximum(z + be_ref[...], 0.0)
    # Decoder: Linear on MXU, bias + Sigmoid (EUP) in f32.
    y = jnp.dot(z.astype(wd_ref.dtype), wd_ref[...],
                preferred_element_type=jnp.float32) + bd_ref[...]
    o_ref[...] = jax.nn.sigmoid(y).astype(o_ref.dtype)


def _pick_block_m(b_pad, d_pad, l_pad, *, max_block_m=512,
                  vmem_budget=24 * 1024 * 1024):
    """Largest batch tile that fits a conservative VMEM budget (v7x-safe)."""
    bm = min(max_block_m, b_pad)
    # Keep >= 2 grid steps for bigger batches so both v7x TensorCores get work
    # (the batch axis is marked "parallel").
    if b_pad >= 64 and b_pad // bm < 2:
        bm = _round_up((b_pad + 1) // 2, 8)

    def _est(bm_):
        x_bytes = bm_ * d_pad * 2 * 2              # bf16 x tile, double-buffered
        out_bytes = bm_ * d_pad * 4 * 2            # f32 out tile, double-buffered
        z_bytes = bm_ * l_pad * 4                  # f32 latent intermediate
        w_bytes = 2 * (d_pad * l_pad * 2)          # two resident bf16 weights
        b_bytes = (l_pad + d_pad) * 4
        return x_bytes + out_bytes + z_bytes + w_bytes + b_bytes

    while bm > 8 and _est(bm) > vmem_budget:
        bm = _round_up(bm // 2, 8)
    return bm


def dense_autoencoder(x, w_enc, b_enc, w_dec, b_dec, *, block_m=None,
                      compute_dtype=jnp.bfloat16):
    """x: [B, input_dim]; w_enc: [latent, input]; w_dec: [input, latent] (PyTorch layout)."""
    B, D = x.shape
    L = w_enc.shape[0]

    # Pad feature / latent dims to the 128-lane width.
    Dp = _round_up(D, 128)
    Lp = _round_up(L, 128)

    # Weight prep (glue, not hot path): transpose to row-major matmul layout,
    # zero-pad, cast matmul operands to bf16, keep biases in f32.
    we = jnp.zeros((Dp, Lp), compute_dtype).at[:D, :L].set(
        jnp.asarray(w_enc, jnp.float32).T.astype(compute_dtype))
    wd = jnp.zeros((Lp, Dp), compute_dtype).at[:L, :D].set(
        jnp.asarray(w_dec, jnp.float32).T.astype(compute_dtype))
    be = jnp.zeros((1, Lp), jnp.float32).at[0, :L].set(
        jnp.asarray(b_enc, jnp.float32))
    bd = jnp.zeros((1, Dp), jnp.float32).at[0, :D].set(
        jnp.asarray(b_dec, jnp.float32))

    if block_m is None:
        block_m = _pick_block_m(_round_up(B, 8), Dp, Lp)
    block_m = max(8, _round_up(block_m, 8))

    # Pad the batch so the grid tiles it exactly (no divisibility assert).
    Bp = _round_up(B, block_m)
    xp = jnp.zeros((Bp, Dp), compute_dtype).at[:B, :D].set(
        jnp.asarray(x, jnp.float32).astype(compute_dtype))

    grid = (Bp // block_m,)
    cost = pl.CostEstimate(
        flops=2 * 2 * Bp * Dp * Lp,               # encoder + decoder matmuls
        transcendentals=Bp * Dp,                  # sigmoid
        bytes_accessed=(xp.size * 2 + Bp * Dp * 4
                        + we.size * 2 + wd.size * 2 + (Lp + Dp) * 4),
    )

    # Constant index_map -> weights/biases stay resident in VMEM across the
    # (sequential) batch grid; only the x/out tiles are re-DMA'd per step.
    def resident(shape):
        return pl.BlockSpec(shape, lambda i: (0, 0))

    out = pl.pallas_call(
        _ae_kernel,
        out_shape=jax.ShapeDtypeStruct((Bp, Dp), jnp.float32),
        grid_spec=pltpu.PrefetchScalarGridSpec(
            num_scalar_prefetch=0,
            grid=grid,
            in_specs=[
                pl.BlockSpec((block_m, Dp), lambda i: (i, 0)),  # x tile
                resident((Dp, Lp)),                             # W_enc^T
                resident((1, Lp)),                              # b_enc
                resident((Lp, Dp)),                             # W_dec^T
                resident((1, Dp)),                              # b_dec
            ],
            out_specs=pl.BlockSpec((block_m, Dp), lambda i: (i, 0)),
        ),
        compiler_params=pltpu.CompilerParams(
            dimension_semantics=("parallel",),
            vmem_limit_bytes=64 * 1024 * 1024,
        ),
        cost_estimate=cost,
    )(xp, we, be, wd, bd)

    return out[:B, :D]


def _reference(x, w_enc, b_enc, w_dec, b_dec):
    z = jnp.maximum(x @ w_enc.T + b_enc, 0.0)
    return jax.nn.sigmoid(z @ w_dec.T + b_dec)


if __name__ == "__main__":
    # Small shapes consistent with a dense autoencoder on flattened inputs.
    B = 16
    input_dim = 128
    latent_dim = 32

    key = jax.random.PRNGKey(0)
    k_x, k_we, k_be, k_wd, k_bd = jax.random.split(key, 5)

    x = jax.random.normal(k_x, (B, input_dim), dtype=jnp.float32)
    # PyTorch Linear layout: [out_features, in_features].
    w_enc = 0.05 * jax.random.normal(k_we, (latent_dim, input_dim), jnp.float32)
    b_enc = 0.05 * jax.random.normal(k_be, (latent_dim,), jnp.float32)
    w_dec = 0.05 * jax.random.normal(k_wd, (input_dim, latent_dim), jnp.float32)
    b_dec = 0.05 * jax.random.normal(k_bd, (input_dim,), jnp.float32)

    out = dense_autoencoder(x, w_enc, b_enc, w_dec, b_dec)
    out = jax.block_until_ready(out)

    ref = _reference(x, w_enc, b_enc, w_dec, b_dec)
    assert out.shape == (B, input_dim)
    # bf16 MXU inputs -> loosened tolerance vs the f32 reference.
    assert jnp.max(jnp.abs(out - ref)) < 2e-2, "mismatch vs reference"

    print("KERNEL_OK")
</pallas_src>

<mosaic_0001>
module attributes {stable_mosaic.version = 11 : i64} {
  func.func @_ae_kernel(%arg0: i32, %arg1: memref<16x128xbf16, #tpu.memory_space<vmem>>, %arg2: memref<128x128xbf16, #tpu.memory_space<vmem>>, %arg3: memref<1x128xf32, #tpu.memory_space<vmem>>, %arg4: memref<128x128xbf16, #tpu.memory_space<vmem>>, %arg5: memref<1x128xf32, #tpu.memory_space<vmem>>, %arg6: memref<16x128xf32, #tpu.memory_space<vmem>>) attributes {dimension_semantics = [#tpu.dimension_semantics<parallel>], iteration_bounds = array<i64: 1>, scalar_prefetch = 0 : i64, scratch_operands = 0 : i64, tpu.core_type = #tpu.core_type<tc>, window_params = [{transform_indices = @transform_0, window_bounds = array<i64: 16, 128>}, {pipeline_mode = #tpu.pipeline_mode<synchronous>, transform_indices = @transform_1, window_bounds = array<i64: 128, 128>}, {pipeline_mode = #tpu.pipeline_mode<synchronous>, transform_indices = @transform_2, window_bounds = array<i64: 1, 128>}, {pipeline_mode = #tpu.pipeline_mode<synchronous>, transform_indices = @transform_3, window_bounds = array<i64: 128, 128>}, {pipeline_mode = #tpu.pipeline_mode<synchronous>, transform_indices = @transform_4, window_bounds = array<i64: 1, 128>}, {transform_indices = @transform_5, window_bounds = array<i64: 16, 128>}]} {
    %c0 = arith.constant 0 : index
    %c0_0 = arith.constant 0 : index
    %0 = vector.load %arg1[%c0, %c0_0] : memref<16x128xbf16, #tpu.memory_space<vmem>>, vector<16x128xbf16>
    %c0_1 = arith.constant 0 : index
    %c0_2 = arith.constant 0 : index
    %1 = vector.load %arg2[%c0_1, %c0_2] : memref<128x128xbf16, #tpu.memory_space<vmem>>, vector<128x128xbf16>
    %cst = arith.constant dense<0.000000e+00> : vector<16x128xf32>
    %2 = tpu.matmul %0, %1, %cst {dimension_numbers = #tpu.dot_dimension_numbers<[1], [0], [0], [1], [0, 0, 1, 1], [], []>} : vector<16x128xbf16>, vector<128x128xbf16>, vector<16x128xf32> -> vector<16x128xf32>
    %c0_3 = arith.constant 0 : index
    %c0_4 = arith.constant 0 : index
    %3 = vector.load %arg3[%c0_3, %c0_4] : memref<1x128xf32, #tpu.memory_space<vmem>>, vector<1x128xf32>
    %4 = vector.broadcast %3 : vector<1x128xf32> to vector<16x128xf32>
    %5 = arith.addf %2, %4 : vector<16x128xf32>
    %cst_5 = arith.constant 0.000000e+00 : f32
    %6 = vector.broadcast %cst_5 : f32 to vector<16x128xf32>
    %7 = arith.maximumf %5, %6 : vector<16x128xf32>
    %8 = arith.truncf %7 : vector<16x128xf32> to vector<16x128xbf16>
    %c0_6 = arith.constant 0 : index
    %c0_7 = arith.constant 0 : index
    %9 = vector.load %arg4[%c0_6, %c0_7] : memref<128x128xbf16, #tpu.memory_space<vmem>>, vector<128x128xbf16>
    %cst_8 = arith.constant dense<0.000000e+00> : vector<16x128xf32>
    %10 = tpu.matmul %8, %9, %cst_8 {dimension_numbers = #tpu.dot_dimension_numbers<[1], [0], [0], [1], [0, 0, 1, 1], [], []>} : vector<16x128xbf16>, vector<128x128xbf16>, vector<16x128xf32> -> vector<16x128xf32>
    %c0_9 = arith.constant 0 : index
    %c0_10 = arith.constant 0 : index
    %11 = vector.load %arg5[%c0_9, %c0_10] : memref<1x128xf32, #tpu.memory_space<vmem>>, vector<1x128xf32>
    %12 = vector.broadcast %11 : vector<1x128xf32> to vector<16x128xf32>
    %13 = arith.addf %10, %12 : vector<16x128xf32>
    %14 = arith.negf %13 : vector<16x128xf32>
    %15 = math.exp %14 : vector<16x128xf32>
    %cst_11 = arith.constant 1.000000e+00 : f32
    %16 = vector.broadcast %cst_11 : f32 to vector<16x128xf32>
    %17 = arith.addf %16, %15 : vector<16x128xf32>
    %18 = arith.divf %16, %17 : vector<16x128xf32>
    %c0_12 = arith.constant 0 : index
    %c0_13 = arith.constant 0 : index
    %19 = vector.load %arg6[%c0_12, %c0_13] : memref<16x128xf32, #tpu.memory_space<vmem>>, vector<16x128xf32>
    tpu.vector_store %arg6[%c0_12, %c0_13], %18 {strides = array<i32>} : memref<16x128xf32, #tpu.memory_space<vmem>>, vector<16x128xf32>,
    return
  }
  func.func @transform_0(%arg0: i32) -> (i32, i32) {
    %c0_i32 = arith.constant 0 : i32
    %c0_i32_0 = arith.constant 0 : i32
    return %arg0, %c0_i32 : i32, i32
  }
  func.func @transform_1(%arg0: i32) -> (i32, i32) {
    %c0_i32 = arith.constant 0 : i32
    %c0_i32_0 = arith.constant 0 : i32
    %c0_i32_1 = arith.constant 0 : i32
    return %c0_i32, %c0_i32_0 : i32, i32
  }
  func.func @transform_2(%arg0: i32) -> (i32, i32) {
    %c0_i32 = arith.constant 0 : i32
    %c0_i32_0 = arith.constant 0 : i32
    %c0_i32_1 = arith.constant 0 : i32
    return %c0_i32, %c0_i32_0 : i32, i32
  }
  func.func @transform_3(%arg0: i32) -> (i32, i32) {
    %c0_i32 = arith.constant 0 : i32
    %c0_i32_0 = arith.constant 0 : i32
    %c0_i32_1 = arith.constant 0 : i32
    return %c0_i32, %c0_i32_0 : i32, i32
  }
  func.func @transform_4(%arg0: i32) -> (i32, i32) {
    %c0_i32 = arith.constant 0 : i32
    %c0_i32_0 = arith.constant 0 : i32
    %c0_i32_1 = arith.constant 0 : i32
    return %c0_i32, %c0_i32_0 : i32, i32
  }
  func.func @transform_5(%arg0: i32) -> (i32, i32) {
    %c0_i32 = arith.constant 0 : i32
    %c0_i32_0 = arith.constant 0 : i32
    return %arg0, %c0_i32 : i32, i32
  }
}

</mosaic_0001>

<bundles_post_ra>
// kernel: tpu_custom_call.1
= control target key start
LH: loop header
LB: loop body
LE: loop exit
PB: predicated region body
PF: predicated region fallthrough
CT: control target
= control target key end

     0   :  { %10 = vsyncpa [#allocation3], 0  ;;  %s566_s0 = inlined_call_operand.hbm [shape: bf16[16,128], index: 0, kind: input, shape index: {}]   ;;  %s567_s1 = inlined_call_operand.hbm [shape: bf16[128,128], index: 1, kind: input, shape index: {}]   ;;  %s568_s2 = inlined_call_operand.vmem [shape: f32[1,128], index: 2, kind: input, shape index: {}]   ;;  %s569_s3 = inlined_call_operand.hbm [shape: bf16[128,128], index: 3, kind: input, shape index: {}]   ;;  %s570_s4 = inlined_call_operand.vmem [shape: f32[1,128], index: 4, kind: input, shape index: {}]   ;;  %s571_s5 = inlined_call_operand.hbm [shape: f32[16,128], index: 5, kind: output, shape index: {}]  }
   0x1   :  { %11 = vsyncpa [#allocation6], 0 }
   0x2   :  { %12 = vsyncpa [#allocation4], 0  ;;  %s30_s20 = sshll.u32 %s567_s1, 4  ;;  %s510_s21 = smov [#allocation5]   ;;  %s31_s20 = int_to_ptr.hbm [resolvable:$true] %s30_s20 }
   0x3   :  { %s32_s22 = sshll.u32 %s510_s21, 4  ;;  %s17_s25 = sshll.u32 %s566_s0, 4  ;;  %s33_s22 = int_to_ptr.vmem [resolvable:$true] %s32_s22  ;;  %s18_s25 = int_to_ptr.hbm [resolvable:$true] %s17_s25 }
   0x4   :  { %s511_s26 = smov 64   ;;  %s512_s27 = smov 4  }
   0x5   :  { %38 = dma.hbm_to_vmem [thread:$0]  %s31_s20, 1024, %s33_s22, [#allocation6], %s511_s26, %s511_s26, %s512_s27  }
   0x6   :  { %s513_s28 = smov [#allocation2]   ;;  %s45_s7 = sshll.u32 %s569_s3, 4  ;;  %s46_s7 = int_to_ptr.hbm [resolvable:$true] %s45_s7 }
   0x7   :  { %s19_s29 = sshll.u32 %s513_s28, 4  ;;  %s514_s1 = smov [#allocation7]   ;;  %s20_s29 = int_to_ptr.vmem [resolvable:$true] %s19_s29 }
   0x8   :  { %25 = dma.hbm_to_vmem [thread:$0]  %s18_s25, 128, %s20_s29, [#allocation3], %s511_s26, %s511_s26, %s512_s27  }
   0x9   :  { %s47_s8 = sshll.u32 %s514_s1, 4  ;;  %s48_s8 = int_to_ptr.vmem [resolvable:$true] %s47_s8 }
   0xa   :  { %53 = dma.hbm_to_vmem [thread:$0]  %s46_s7, 1024, %s48_s8, [#allocation6], %s511_s26, %s511_s26, %s512_s27  }
   0xb   :  { %504 = dma.done.wait [#allocation3], 128  }
   0xc   :  { %505 = vsyncadd [#allocation3], 4294967168 }
   0xd   :  { %506 = dma.done.wait [#allocation6], 2048  }
   0xe   :  { %507 = vsyncadd [#allocation6], 4294965248  ;;  %v381_v0 = vld [vmem:[#allocation5 + $0x38] sm:$0xff]  ;;  %v380_v1 = vld [vmem:[#allocation5 + $0x30] sm:$0xff]  ;;  %s289_s13 = sshll.u32 %s571_s5, 4  ;;  %s516_s14 = smov 128   ;;  %s290_s13 = int_to_ptr.hbm [resolvable:$true] %s289_s13 }
   0xf   :  { %144 = vmatpush.bf16.msra.mxu0 %v381_v0  ;;  %v389_v2 = vld [vmem:[#allocation7 + $0x38] sm:$0xff]  ;;  %v388_v3 = vld [vmem:[#allocation7 + $0x30] sm:$0xff]  ;;  %v379_v4 = vld [vmem:[#allocation5 + $0x28] sm:$0xff]  ;;  %s517_s15 = smov 8  }
  0x10   :  { %229 = vmatpush.bf16.msra.mxu1 %v389_v2  ;;  %v387_v5 = vld [vmem:[#allocation7 + $0x28] sm:$0xff]  ;;  %v378_v6 = vld [vmem:[#allocation5 + $0x20] sm:$0xff]  ;;  %v377_v8 = vld [vmem:[#allocation5 + $0x18] sm:$0xff] }
  0x11   :  { %v386_v7 = vld [vmem:[#allocation7 + $0x20] sm:$0xff]  ;;  %v376_v9 = vld [vmem:[#allocation5 + $0x10] sm:$0xff]  ;;  %v375_v10 = vld [vmem:[#allocation5 + $0x8] sm:$0xff] }
  0x12   :  { %v374_v11 = vld [vmem:[#allocation5] sm:$0xff]  ;;  %v373_v12 = vld [vmem:[#allocation2] sm:$0xff]  ;;  %v384_v14 = vld [vmem:[#allocation7 + $0x10] sm:$0xff] }
  0x13   :  { %145 = vmatpush.bf16.msra.mxu0 %v380_v1  ;;  %v385_v13 = vld [vmem:[#allocation7 + $0x18] sm:$0xff]  ;;  %v383_v15 = vld [vmem:[#allocation7 + $0x8] sm:$0xff]  ;;  %v382_v16 = vld [vmem:[#allocation7] sm:$0xff] }
  0x14   :  { %230 = vmatpush.bf16.msra.mxu1 %v388_v3  ;;  %v398_v18 = vld [vmem:[%s568_s2] ss:$0 sm:$0xff]  ;;  %s515_s2 = smov [#allocation8]  }
  0x15   :  { %v399_v25 = vld [vmem:[%s570_s4] ss:$0 sm:$0xff]  ;;  %s287_s4 = sshll.u32 %s515_s2, 4  ;;  %s288_s4 = int_to_ptr.vmem [resolvable:$true] %s287_s4 }
  0x17   :  { %146 = vmatpush.bf16.msra.mxu0 %v379_v4 }
  0x18   :  { %231 = vmatpush.bf16.msra.mxu1 %v387_v5 }
  0x1b   :  { %147 = vmatpush.bf16.msra.mxu0 %v378_v6 }
  0x1c   :  { %232 = vmatpush.bf16.msra.mxu1 %v386_v7 }
  0x1f   :  { %148 = vmatpush.bf16.msra.mxu0 %v377_v8 }
  0x20   :  { %233 = vmatpush.bf16.msra.mxu1 %v385_v13 }
  0x23   :  { %149 = vmatpush.bf16.msra.mxu0 %v376_v9 }
  0x24   :  { %234 = vmatpush.bf16.msra.mxu1 %v384_v14 }
  0x27   :  { %150 = vmatpush.bf16.msra.mxu0 %v375_v10 }
  0x28   :  { %235 = vmatpush.bf16.msra.mxu1 %v383_v15 }
  0x2b   :  { %151 = vmatpush.bf16.msra.mxu0 %v374_v11 }
  0x2c   :  { %236 = vmatpush.bf16.msra.mxu1 %v382_v16 }
  0x2e   :  { %152 = vmatmul.bf16.vlgmr.msra.gmra.mxu0 %v373_v12 }
  0xab   :  { %v153_v17 = vpop.f32.mrf.mxu0 }
  0xac   :  { %v154_v19 = vadd.f32 %v398_v18, %v153_v17 }
  0xae   :  { %v158_v22 = vmax.f32 %v154_v19, 0.0 }
  0xb3   :  { %v155_v20 = vpop.f32.mrf.mxu0 }
  0xb4   :  { %v156_v21 = vadd.f32 %v398_v18, %v155_v20 }
  0xb6   :  { %v159_v23 = vmax.f32 %v156_v21, 0.0 }
  0xb8   :  { %v160_v24 = vpack.c.bf16 %v159_v23, %v158_v22 }
  0xba   :  { %237 = vmatmul.bf16.vlgmr.msra.gmra.mxu1 %v160_v24 }
 0x137   :  { %v238_v26 = vpop.f32.mrf.mxu1 }
 0x138   :  { %v239_v27 = vadd.f32 %v399_v25, %v238_v26 }
 0x13a   :  { %v371_v28 = vmul.f32 -1.442695, %v239_v27 }
 0x13c   :  { %400 = vpow2.f32 %v371_v28 }
 0x13f   :  { %v240_v29 = vpop.f32.mrf.mxu1 }
 0x140   :  { %v241_v30 = vadd.f32 %v399_v25, %v240_v29 }
 0x142   :  { %v401_v31 = vpop.eup %400  ;;  %v372_v32 = vmul.f32 -1.442695, %v241_v30 }
 0x143   :  { %v249_v33 = vadd.f32 1.0, %v401_v31 }
 0x144   :  { %402 = vpow2.f32 %v372_v32 }
 0x145   :  { %404 = vrcp.f32 %v249_v33  ;;  %v262_v39 = vand.u32 2147483648, %v249_v33  ;;  %v260_v41 = vand.u32 2147483647, %v249_v33  ;;  %vm256_vm1 = vweird.f32 %v249_v33 }
 0x147   :  { %v263_v44 = vor.u32 1.1754944e-38, %v262_v39  ;;  %vm261_vm3 = vcmp.eq.f32.partialorder %v260_v41, 8.507059e+37 }
 0x14a   :  { %v403_v34 = vpop.eup %402 }
 0x14b   :  { %v405_v35 = vpop.eup %404  ;;  %v250_v36 = vadd.f32 1.0, %v403_v34 }
 0x14c   :  { %v252_v37 = vmul.f32 %v405_v35, %v249_v33  ;;  %vm257_vm0 = vweird.f32 %v405_v35 }
 0x14d   :  { %406 = vrcp.f32 %v250_v36  ;;  %vm258_vm2 = vmor %vm256_vm1, %vm257_vm0  ;;  %v277_v49 = vand.u32 2147483648, %v250_v36  ;;  %v275_v51 = vand.u32 2147483647, %v250_v36  ;;  %vm271_vm5 = vweird.f32 %v250_v36 }
 0x14e   :  { %v253_v38 = vsub.f32 1.0, %v252_v37 }
 0x14f   :  { %v278_v53 = vor.u32 1.1754944e-38, %v277_v49  ;;  %vm276_vm7 = vcmp.eq.f32.partialorder %v275_v51, 8.507059e+37 }
 0x150   :  { %v254_v40 = vmul.f32 %v405_v35, %v253_v38 }
 0x152   :  { %v255_v42 = vadd.f32 %v405_v35, %v254_v40 }
 0x153   :  { %v407_v43 = vpop.eup %406 }
 0x154   :  { %v267_v45 = vmul.f32 %v407_v43, %v250_v36  ;;  %v259_v46 = vsel %vm258_vm2, %v405_v35, %v255_v42  ;;  %vm272_vm4 = vweird.f32 %v407_v43 }
 0x155   :  { %v264_v47 = vsel %vm261_vm3, %v263_v44, %v259_v46  ;;  %vm273_vm6 = vmor %vm271_vm5, %vm272_vm4 }
 0x156   :  { %v268_v48 = vsub.f32 1.0, %v267_v45  ;;  %281 = vst [vmem:[#allocation8] sm:$0xff] %v264_v47 }
 0x158   :  { %v269_v50 = vmul.f32 %v407_v43, %v268_v48 }
 0x15a   :  { %v270_v52 = vadd.f32 %v407_v43, %v269_v50 }
 0x15c   :  { %v274_v54 = vsel %vm273_vm6, %v407_v43, %v270_v52 }
 0x15d   :  { %v279_v55 = vsel %vm276_vm7, %v278_v53, %v274_v54 }
 0x15e   :  { %282 = vst [vmem:[#allocation8 + $0x8] sm:$0xff] %v279_v55 }
 0x15f   :  { %295 = dma.vmem_to_hbm [thread:$0]  %s288_s4, 256, %s290_s13, [#allocation4], %s516_s14, %s516_s14, %s517_s15  }
 0x160   :  { %508 = dma.done.wait [#allocation4], 256  }
 0x161   :  { %509 = vsyncadd [#allocation4], 4294967040 }
 0x162   :  { %300 = vsyncpa [#allocation3], 1 }
 0x163   :  { %301 = vsyncpa [#allocation6], 1 }
 0x164   :  { %302 = vsyncpa [#allocation4], 1 }

</bundles_post_ra>
